<compile_context>
chip_gen: v7x
topology: tpu7x:2x2x1
jax: 0.10.0
libtpu: 0.0.40
codegen_flags: <defaults>
</compile_context>

<pallas_src>
import functools
import math

import jax
import jax.numpy as jnp
from jax.experimental import pallas as pl
from jax.experimental.pallas import tpu as pltpu

# --- synthetic hyperparameters (hp.*) -----------------------------------------
ENC_HIDDEN = 32   # hp.encoder_hidden
FILTER     = 32   # hp.variance_predictor_filter_size
KERNEL     = 3    # hp.variance_predictor_kernel_size (=> padding 1 for both convs)
EPS        = 1e-5 # nn.LayerNorm default eps
# hp.variance_predictor_dropout is irrelevant at inference (identity)


def _cdiv(a, b):
    return -(-a // b)


def _layernorm_last(h, gamma, beta):
    mean = jnp.mean(h, axis=-1, keepdims=True)
    var = jnp.mean((h - mean) ** 2, axis=-1, keepdims=True)
    return (h - mean) * jax.lax.rsqrt(var + EPS) * gamma + beta


def variance_predictor_kernel(x_ref, mask_ref, w1_ref, w2_ref, p_ref, out_ref, *,
                              seq_len):
    x = x_ref[...]                                   # (H, N) f32, time on lanes
    N = x.shape[1]

    # Sequence-boundary masks built in-kernel (no DMA / no VMEM input):
    # t = position of each lane within its own sequence.
    t = jax.lax.broadcasted_iota(jnp.int32, (1, N), 1) % seq_len
    nf = (t != 0).astype(jnp.float32)                # a previous timestep exists
    nl = (t != seq_len - 1).astype(jnp.float32)      # a next timestep exists

    b1, g1, be1 = p_ref[:, 0:1], p_ref[:, 1:2], p_ref[:, 2:3]
    b2, g2, be2 = p_ref[:, 3:4], p_ref[:, 4:5], p_ref[:, 5:6]
    wl = p_ref[:, 6:7]
    bl = p_ref[0, 7]

    def conv3(h, wcat):
        # kernel-3 / padding-1 conv as ONE matmul: stack [h[t-1]; h[t]; h[t+1]] along
        # the contraction.  Lane rolls wrap around the block; nf/nl zero the wrapped /
        # cross-sequence columns (this matches the conv's zero padding exactly).
        h_prev = pltpu.roll(h, shift=1, axis=1) * nf          # h[:, t-1]
        h_next = pltpu.roll(h, shift=N - 1, axis=1) * nl      # h[:, t+1]
        h3 = jnp.concatenate([h_prev, h, h_next], axis=0)     # (3C, N)
        return jnp.dot(wcat, h3, preferred_element_type=jnp.float32)

    def layernorm_cols(h, g, be):
        mu = jnp.mean(h, axis=0, keepdims=True)               # (1, N) sublane reduce
        d = h - mu
        var = jnp.mean(d * d, axis=0, keepdims=True)
        return d * jax.lax.rsqrt(var + EPS) * g + be          # g, be: (F, 1)

    # ---- conv1d_1 -> relu_1 -> layer_norm_1 (dropout_1 = identity) ----
    h = jnp.maximum(conv3(x, w1_ref[...]) + b1, 0.0)
    h = layernorm_cols(h, g1, be1)

    # ---- conv1d_2 -> relu_2 -> layer_norm_2 (dropout_2 = identity) ----
    h = jnp.maximum(conv3(h, w2_ref[...]) + b2, 0.0)
    h = layernorm_cols(h, g2, be2)

    # ---- linear (F -> 1) + squeeze(-1) + masked_fill ----
    o = jnp.sum(h * wl, axis=0, keepdims=True) + bl           # (1, N) lane-dense
    out_ref[...] = jnp.where(mask_ref[...] != 0.0, 0.0, o)


def _choose_blocking(batch, seq_len):
    """Sequences per block (BB) and grid size so that N = BB*T is a multiple of 128
    (lane-dense blocks, unmasked stores, (8,128)-clean) and the grid has >= 2 (even)
    steps: real DMA/compute pipelining and both v7x TensorCores busy."""
    step = 128 // math.gcd(seq_len, 128)              # smallest BB with BB*T % 128 == 0
    bb_target = max(step, ((2048 // max(seq_len, 1)) // step) * step)  # ~2k lanes/block
    bb_cover = _cdiv(_cdiv(batch, 2), step) * step    # just enough to keep >= 2 blocks
    bb = max(step, min(bb_target, bb_cover))
    nblocks = max(2, _cdiv(batch, bb))
    nblocks += nblocks % 2
    return bb, nblocks


def variance_predictor(x, mask, params):
    """x: (B, T, H) f32, mask: (B, T) bool (True = padded) -> (B, T) f32."""
    B, T, H = x.shape
    w1, w2 = params["w1"], params["w2"]
    K, _, F = w1.shape
    assert K == KERNEL == 3, "conv1d_2 uses hard-coded padding=1 (kernel must be 3)"

    BB, nblocks = _choose_blocking(B, T)
    B_pad = BB * nblocks
    N = BB * T                                         # lanes per grid step
    rows = B_pad * T

    if B_pad != B:
        x = jnp.pad(x, ((0, B_pad - B), (0, 0), (0, 0)))
        mask = jnp.pad(mask, ((0, B_pad - B), (0, 0)), constant_values=True)

    # Layout plumbing (one cheap HBM pass by XLA): time on lanes, channels on sublanes.
    x_t = x.reshape(rows, H).T                                  # (H, rows)
    mask_f = mask.reshape(1, rows).astype(jnp.float32)          # 1.0 = padded position

    # Conv taps packed on the contraction: wcat = [w[0]^T | w[1]^T | w[2]^T]  (F, 3*Cin)
    w1cat = jnp.concatenate([w1[0].T, w1[1].T, w1[2].T], axis=1)
    w2cat = jnp.concatenate([w2[0].T, w2[1].T, w2[2].T], axis=1)
    # The eight per-channel vectors as columns of one (F, 8) array.
    pcol = jnp.stack(
        [params["b1"][0], params["g1"][0], params["be1"][0],
         params["b2"][0], params["g2"][0], params["be2"][0],
         params["wl"][0], jnp.full((F,), params["bl"][0, 0], jnp.float32)], axis=1)

    flops = 2 * rows * (3 * H * F + 3 * F * F + F)
    bytes_accessed = 4 * (x_t.size + mask_f.size + rows
                          + w1cat.size + w2cat.size + pcol.size)

    out = pl.pallas_call(
        functools.partial(variance_predictor_kernel, seq_len=T),
        grid=(nblocks,),
        in_specs=[
            pl.BlockSpec((H, N), lambda i: (0, i)),          # activations (time on lanes)
            pl.BlockSpec((1, N), lambda i: (0, i)),          # padding mask (lane-dense)
            pl.BlockSpec(w1cat.shape, lambda i: (0, 0)),     # conv1 packed weights
            pl.BlockSpec(w2cat.shape, lambda i: (0, 0)),     # conv2 packed weights
            pl.BlockSpec(pcol.shape, lambda i: (0, 0)),      # bias / LN / linear params
        ],
        out_specs=pl.BlockSpec((1, N), lambda i: (0, i)),
        out_shape=jax.ShapeDtypeStruct((1, rows), jnp.float32),
        compiler_params=pltpu.CompilerParams(
            dimension_semantics=("parallel",),
            vmem_limit_bytes=32 * 1024 * 1024),
        cost_estimate=pl.CostEstimate(flops=flops, transcendentals=2 * rows,
                                      bytes_accessed=bytes_accessed),
    )(x_t, mask_f, w1cat, w2cat, pcol)

    return out.reshape(B_pad, T)[:B]


# --------------------------- pure-JAX reference -------------------------------
def variance_predictor_ref(x, mask, p):
    dn = ("NWC", "WIO", "NWC")
    h = jax.lax.conv_general_dilated(x, p["w1"], window_strides=(1,),
                                     padding=[(1, 1)], dimension_numbers=dn) + p["b1"]
    h = jax.nn.relu(h)
    h = _layernorm_last(h, p["g1"], p["be1"])
    h = jax.lax.conv_general_dilated(h, p["w2"], window_strides=(1,),
                                     padding=[(1, 1)], dimension_numbers=dn) + p["b2"]
    h = jax.nn.relu(h)
    h = _layernorm_last(h, p["g2"], p["be2"])
    o = jnp.einsum("btf,f->bt", h, p["wl"][0]) + p["bl"][0, 0]
    return jnp.where(mask, 0.0, o)


def init_params(key):
    ks = jax.random.split(key, 4)

    def xavier(k, shape, fan_in, fan_out):
        lim = (6.0 / (fan_in + fan_out)) ** 0.5
        return jax.random.uniform(k, shape, jnp.float32, -lim, lim)

    # conv weights stored as (K, C_in, C_out)  (== torch Conv1d weight permuted (2,1,0))
    w1 = xavier(ks[0], (KERNEL, ENC_HIDDEN, FILTER), ENC_HIDDEN * KERNEL, FILTER * KERNEL)
    w2 = xavier(ks[1], (KERNEL, FILTER, FILTER), FILTER * KERNEL, FILTER * KERNEL)
    wl = xavier(ks[2], (1, FILTER), FILTER, 1)                 # Linear(F, 1) weight row
    return {
        "w1": w1, "b1": jnp.full((1, FILTER), 0.01, jnp.float32),
        "g1": jnp.ones((1, FILTER), jnp.float32), "be1": jnp.zeros((1, FILTER), jnp.float32),
        "w2": w2, "b2": jnp.full((1, FILTER), -0.01, jnp.float32),
        "g2": jnp.ones((1, FILTER), jnp.float32), "be2": jnp.zeros((1, FILTER), jnp.float32),
        "wl": wl, "bl": jnp.full((1, 1), 0.05, jnp.float32),
    }


if __name__ == "__main__":
    B, T = 2, 16
    key = jax.random.PRNGKey(0)
    k_x, k_p = jax.random.split(key)

    x = jax.random.normal(k_x, (B, T, ENC_HIDDEN), jnp.float32)
    lengths = jnp.array([12, 9])
    mask = jnp.arange(T)[None, :] >= lengths[:, None]          # (B, T) bool, True = padded
    params = init_params(k_p)

    vp = jax.jit(variance_predictor)
    out = jax.block_until_ready(vp(x, mask, params))

    ref = variance_predictor_ref(x, mask, params)
    assert out.shape == (B, T)
    assert jnp.allclose(out, ref, atol=1e-4, rtol=1e-4), (
        f"max abs err {jnp.max(jnp.abs(out - ref))}")

    print("KERNEL_OK")
</pallas_src>

<mosaic_0001>
module attributes {stable_mosaic.version = 11 : i64} {
  func.func @variance_predictor_kernel(%arg0: i32, %arg1: memref<32x128xf32, #tpu.memory_space<vmem>>, %arg2: memref<1x128xf32, #tpu.memory_space<vmem>>, %arg3: memref<32x96xf32, #tpu.memory_space<vmem>>, %arg4: memref<32x96xf32, #tpu.memory_space<vmem>>, %arg5: memref<32x8xf32, #tpu.memory_space<vmem>>, %arg6: memref<1x128xf32, #tpu.memory_space<vmem>>) attributes {dimension_semantics = [#tpu.dimension_semantics<parallel>], iteration_bounds = array<i64: 2>, scalar_prefetch = 0 : i64, scratch_operands = 0 : i64, tpu.core_type = #tpu.core_type<tc>, window_params = [{transform_indices = @transform_0, window_bounds = array<i64: 32, 128>}, {transform_indices = @transform_1, window_bounds = array<i64: 1, 128>}, {pipeline_mode = #tpu.pipeline_mode<synchronous>, transform_indices = @transform_2, window_bounds = array<i64: 32, 96>}, {pipeline_mode = #tpu.pipeline_mode<synchronous>, transform_indices = @transform_3, window_bounds = array<i64: 32, 96>}, {pipeline_mode = #tpu.pipeline_mode<synchronous>, transform_indices = @transform_4, window_bounds = array<i64: 32, 8>}, {transform_indices = @transform_5, window_bounds = array<i64: 1, 128>}]} {
    %c0 = arith.constant 0 : index
    %c0_0 = arith.constant 0 : index
    %0 = vector.load %arg1[%c0, %c0_0] : memref<32x128xf32, #tpu.memory_space<vmem>>, vector<32x128xf32>
    %1 = tpu.iota {dimensions = array<i32: 1>} : vector<1x128xi32>
    %c16_i32 = arith.constant 16 : i32
    %c0_i32 = arith.constant 0 : i32
    %2 = arith.cmpi eq, %c16_i32, %c0_i32 : i32
    %c1_i32 = arith.constant 1 : i32
    %3 = arith.select %2, %c1_i32, %c16_i32 : i32
    %4 = vector.broadcast %3 : i32 to vector<1x128xi32>
    %5 = arith.remsi %1, %4 : vector<1x128xi32>
    %c0_i32_1 = arith.constant 0 : i32
    %6 = vector.broadcast %c0_i32_1 : i32 to vector<1x128xi32>
    %7 = arith.cmpi ne, %5, %6 : vector<1x128xi32>
    %c0_i32_2 = arith.constant 0 : i32
    %8 = vector.broadcast %c0_i32_2 : i32 to vector<1x128xi32>
    %9 = arith.cmpi slt, %5, %8 : vector<1x128xi32>
    %c0_i32_3 = arith.constant 0 : i32
    %10 = arith.cmpi slt, %3, %c0_i32_3 : i32
    %11 = vector.broadcast %10 : i1 to vector<1x128xi1>
    %12 = vector.broadcast %11 : vector<1x128xi1> to vector<1x128xi1>
    %13 = arith.xori %9, %12 : vector<1x128xi1>
    %14 = arith.andi %13, %7 : vector<1x128xi1>
    %15 = vector.broadcast %3 : i32 to vector<1x128xi32>
    %16 = arith.addi %5, %15 : vector<1x128xi32>
    %17 = arith.select %14, %16, %5 : vector<1x128xi1>, vector<1x128xi32>
    %c0_i32_4 = arith.constant 0 : i32
    %18 = vector.broadcast %c0_i32_4 : i32 to vector<1x128xi32>
    %19 = arith.cmpi ne, %17, %18 : vector<1x128xi32>
    %20 = arith.extui %19 : vector<1x128xi1> to vector<1x128xi32>
    %21 = arith.sitofp %20 : vector<1x128xi32> to vector<1x128xf32>
    %c15_i32 = arith.constant 15 : i32
    %22 = vector.broadcast %c15_i32 : i32 to vector<1x128xi32>
    %23 = arith.cmpi ne, %17, %22 : vector<1x128xi32>
    %24 = arith.extui %23 : vector<1x128xi1> to vector<1x128xi32>
    %25 = arith.sitofp %24 : vector<1x128xi32> to vector<1x128xf32>
    %c0_5 = arith.constant 0 : index
    %c0_6 = arith.constant 0 : index
    %26 = vector.load %arg5[%c0_5, %c0_6] : memref<32x8xf32, #tpu.memory_space<vmem>>, vector<32x1xf32>
    %c0_7 = arith.constant 0 : index
    %c1 = arith.constant 1 : index
    %27 = vector.load %arg5[%c0_7, %c1] : memref<32x8xf32, #tpu.memory_space<vmem>>, vector<32x1xf32>
    %c0_8 = arith.constant 0 : index
    %c2 = arith.constant 2 : index
    %28 = vector.load %arg5[%c0_8, %c2] : memref<32x8xf32, #tpu.memory_space<vmem>>, vector<32x1xf32>
    %c0_9 = arith.constant 0 : index
    %c3 = arith.constant 3 : index
    %29 = vector.load %arg5[%c0_9, %c3] : memref<32x8xf32, #tpu.memory_space<vmem>>, vector<32x1xf32>
    %c0_10 = arith.constant 0 : index
    %c4 = arith.constant 4 : index
    %30 = vector.load %arg5[%c0_10, %c4] : memref<32x8xf32, #tpu.memory_space<vmem>>, vector<32x1xf32>
    %c0_11 = arith.constant 0 : index
    %c5 = arith.constant 5 : index
    %31 = vector.load %arg5[%c0_11, %c5] : memref<32x8xf32, #tpu.memory_space<vmem>>, vector<32x1xf32>
    %c0_12 = arith.constant 0 : index
    %c6 = arith.constant 6 : index
    %32 = vector.load %arg5[%c0_12, %c6] : memref<32x8xf32, #tpu.memory_space<vmem>>, vector<32x1xf32>
    %c0_13 = arith.constant 0 : index
    %c7 = arith.constant 7 : index
    %33 = vector.load %arg5[%c0_13, %c7] : memref<32x8xf32, #tpu.memory_space<vmem>>, vector<1x1xf32>
    %34 = vector.extract %33[0, 0] : f32 from vector<1x1xf32>
    %c0_14 = arith.constant 0 : index
    %c0_15 = arith.constant 0 : index
    %35 = vector.load %arg3[%c0_14, %c0_15] : memref<32x96xf32, #tpu.memory_space<vmem>>, vector<32x96xf32>
    %c1_i32_16 = arith.constant 1 : i32
    %36 = tpu.dynamic_rotate %0 by %c1_i32_16 dim 1 : vector<32x128xf32>, i32 -> vector<32x128xf32>
    %37 = vector.broadcast %21 : vector<1x128xf32> to vector<32x128xf32>
    %38 = arith.mulf %36, %37 : vector<32x128xf32>
    %c127_i32 = arith.constant 127 : i32
    %39 = tpu.dynamic_rotate %0 by %c127_i32 dim 1 : vector<32x128xf32>, i32 -> vector<32x128xf32>
    %40 = vector.broadcast %25 : vector<1x128xf32> to vector<32x128xf32>
    %41 = arith.mulf %39, %40 : vector<32x128xf32>
    %42 = tpu.concatenate %38, %0, %41 in 0 : vector<32x128xf32>, vector<32x128xf32>, vector<32x128xf32> -> vector<96x128xf32>
    %cst = arith.constant dense<0.000000e+00> : vector<32x128xf32>
    %43 = tpu.matmul %35, %42, %cst {dimension_numbers = #tpu.dot_dimension_numbers<[1], [0], [0], [1], [0, 0, 1, 1], [], []>} : vector<32x96xf32>, vector<96x128xf32>, vector<32x128xf32> -> vector<32x128xf32>
    %44 = vector.broadcast %26 : vector<32x1xf32> to vector<32x128xf32>
    %45 = arith.addf %43, %44 : vector<32x128xf32>
    %cst_17 = arith.constant 0.000000e+00 : f32
    %46 = vector.broadcast %cst_17 : f32 to vector<32x128xf32>
    %47 = arith.maximumf %45, %46 : vector<32x128xf32>
    %cst_18 = arith.constant dense<0.000000e+00> : vector<128xf32>
    %48 = vector.multi_reduction <add>, %47, %cst_18 [0] : vector<32x128xf32> to vector<128xf32>
    %49 = vector.shape_cast %48 : vector<128xf32> to vector<1x128xf32>
    %cst_19 = arith.constant 3.200000e+01 : f32
    %50 = vector.broadcast %cst_19 : f32 to vector<1x128xf32>
    %51 = arith.divf %49, %50 : vector<1x128xf32>
    %52 = vector.broadcast %51 : vector<1x128xf32> to vector<32x128xf32>
    %53 = arith.subf %47, %52 : vector<32x128xf32>
    %54 = arith.mulf %53, %53 : vector<32x128xf32>
    %cst_20 = arith.constant dense<0.000000e+00> : vector<128xf32>
    %55 = vector.multi_reduction <add>, %54, %cst_20 [0] : vector<32x128xf32> to vector<128xf32>
    %56 = vector.shape_cast %55 : vector<128xf32> to vector<1x128xf32>
    %cst_21 = arith.constant 3.200000e+01 : f32
    %57 = vector.broadcast %cst_21 : f32 to vector<1x128xf32>
    %58 = arith.divf %56, %57 : vector<1x128xf32>
    %cst_22 = arith.constant 9.99999974E-6 : f32
    %59 = vector.broadcast %cst_22 : f32 to vector<1x128xf32>
    %60 = arith.addf %58, %59 : vector<1x128xf32>
    %61 = math.rsqrt %60 : vector<1x128xf32>
    %62 = vector.broadcast %61 : vector<1x128xf32> to vector<32x128xf32>
    %63 = arith.mulf %53, %62 : vector<32x128xf32>
    %64 = vector.broadcast %27 : vector<32x1xf32> to vector<32x128xf32>
    %65 = arith.mulf %63, %64 : vector<32x128xf32>
    %66 = vector.broadcast %28 : vector<32x1xf32> to vector<32x128xf32>
    %67 = arith.addf %65, %66 : vector<32x128xf32>
    %c0_23 = arith.constant 0 : index
    %c0_24 = arith.constant 0 : index
    %68 = vector.load %arg4[%c0_23, %c0_24] : memref<32x96xf32, #tpu.memory_space<vmem>>, vector<32x96xf32>
    %c1_i32_25 = arith.constant 1 : i32
    %69 = tpu.dynamic_rotate %67 by %c1_i32_25 dim 1 : vector<32x128xf32>, i32 -> vector<32x128xf32>
    %70 = vector.broadcast %21 : vector<1x128xf32> to vector<32x128xf32>
    %71 = arith.mulf %69, %70 : vector<32x128xf32>
    %c127_i32_26 = arith.constant 127 : i32
    %72 = tpu.dynamic_rotate %67 by %c127_i32_26 dim 1 : vector<32x128xf32>, i32 -> vector<32x128xf32>
    %73 = vector.broadcast %25 : vector<1x128xf32> to vector<32x128xf32>
    %74 = arith.mulf %72, %73 : vector<32x128xf32>
    %75 = tpu.concatenate %71, %67, %74 in 0 : vector<32x128xf32>, vector<32x128xf32>, vector<32x128xf32> -> vector<96x128xf32>
    %cst_27 = arith.constant dense<0.000000e+00> : vector<32x128xf32>
    %76 = tpu.matmul %68, %75, %cst_27 {dimension_numbers = #tpu.dot_dimension_numbers<[1], [0], [0], [1], [0, 0, 1, 1], [], []>} : vector<32x96xf32>, vector<96x128xf32>, vector<32x128xf32> -> vector<32x128xf32>
    %77 = vector.broadcast %29 : vector<32x1xf32> to vector<32x128xf32>
    %78 = arith.addf %76, %77 : vector<32x128xf32>
    %cst_28 = arith.constant 0.000000e+00 : f32
    %79 = vector.broadcast %cst_28 : f32 to vector<32x128xf32>
    %80 = arith.maximumf %78, %79 : vector<32x128xf32>
    %cst_29 = arith.constant dense<0.000000e+00> : vector<128xf32>
    %81 = vector.multi_reduction <add>, %80, %cst_29 [0] : vector<32x128xf32> to vector<128xf32>
    %82 = vector.shape_cast %81 : vector<128xf32> to vector<1x128xf32>
    %cst_30 = arith.constant 3.200000e+01 : f32
    %83 = vector.broadcast %cst_30 : f32 to vector<1x128xf32>
    %84 = arith.divf %82, %83 : vector<1x128xf32>
    %85 = vector.broadcast %84 : vector<1x128xf32> to vector<32x128xf32>
    %86 = arith.subf %80, %85 : vector<32x128xf32>
    %87 = arith.mulf %86, %86 : vector<32x128xf32>
    %cst_31 = arith.constant dense<0.000000e+00> : vector<128xf32>
    %88 = vector.multi_reduction <add>, %87, %cst_31 [0] : vector<32x128xf32> to vector<128xf32>
    %89 = vector.shape_cast %88 : vector<128xf32> to vector<1x128xf32>
    %cst_32 = arith.constant 3.200000e+01 : f32
    %90 = vector.broadcast %cst_32 : f32 to vector<1x128xf32>
    %91 = arith.divf %89, %90 : vector<1x128xf32>
    %cst_33 = arith.constant 9.99999974E-6 : f32
    %92 = vector.broadcast %cst_33 : f32 to vector<1x128xf32>
    %93 = arith.addf %91, %92 : vector<1x128xf32>
    %94 = math.rsqrt %93 : vector<1x128xf32>
    %95 = vector.broadcast %94 : vector<1x128xf32> to vector<32x128xf32>
    %96 = arith.mulf %86, %95 : vector<32x128xf32>
    %97 = vector.broadcast %30 : vector<32x1xf32> to vector<32x128xf32>
    %98 = arith.mulf %96, %97 : vector<32x128xf32>
    %99 = vector.broadcast %31 : vector<32x1xf32> to vector<32x128xf32>
    %100 = arith.addf %98, %99 : vector<32x128xf32>
    %101 = vector.broadcast %32 : vector<32x1xf32> to vector<32x128xf32>
    %102 = arith.mulf %100, %101 : vector<32x128xf32>
    %cst_34 = arith.constant dense<0.000000e+00> : vector<128xf32>
    %103 = vector.multi_reduction <add>, %102, %cst_34 [0] : vector<32x128xf32> to vector<128xf32>
    %104 = vector.shape_cast %103 : vector<128xf32> to vector<1x128xf32>
    %105 = vector.broadcast %34 : f32 to vector<1x128xf32>
    %106 = arith.addf %104, %105 : vector<1x128xf32>
    %c0_35 = arith.constant 0 : index
    %c0_36 = arith.constant 0 : index
    %107 = vector.load %arg2[%c0_35, %c0_36] : memref<1x128xf32, #tpu.memory_space<vmem>>, vector<1x128xf32>
    %cst_37 = arith.constant 0.000000e+00 : f32
    %108 = vector.broadcast %cst_37 : f32 to vector<1x128xf32>
    %109 = arith.cmpf one, %107, %108 : vector<1x128xf32>
    %cst_38 = arith.constant 0.000000e+00 : f32
    %110 = vector.broadcast %cst_38 : f32 to vector<1x128xf32>
    %111 = arith.select %109, %110, %106 : vector<1x128xi1>, vector<1x128xf32>
    %c0_39 = arith.constant 0 : index
    %c0_40 = arith.constant 0 : index
    %112 = vector.load %arg6[%c0_39, %c0_40] : memref<1x128xf32, #tpu.memory_space<vmem>>, vector<1x128xf32>
    tpu.vector_store %arg6[%c0_39, %c0_40], %111 {strides = array<i32>} : memref<1x128xf32, #tpu.memory_space<vmem>>, vector<1x128xf32>,
    return
  }
  func.func @transform_0(%arg0: i32) -> (i32, i32) {
    %c0_i32 = arith.constant 0 : i32
    %c0_i32_0 = arith.constant 0 : i32
    return %c0_i32, %arg0 : i32, i32
  }
  func.func @transform_1(%arg0: i32) -> (i32, i32) {
    %c0_i32 = arith.constant 0 : i32
    %c0_i32_0 = arith.constant 0 : i32
    return %c0_i32, %arg0 : i32, i32
  }
  func.func @transform_2(%arg0: i32) -> (i32, i32) {
    %c0_i32 = arith.constant 0 : i32
    %c0_i32_0 = arith.constant 0 : i32
    %c0_i32_1 = arith.constant 0 : i32
    return %c0_i32, %c0_i32_0 : i32, i32
  }
  func.func @transform_3(%arg0: i32) -> (i32, i32) {
    %c0_i32 = arith.constant 0 : i32
    %c0_i32_0 = arith.constant 0 : i32
    %c0_i32_1 = arith.constant 0 : i32
    return %c0_i32, %c0_i32_0 : i32, i32
  }
  func.func @transform_4(%arg0: i32) -> (i32, i32) {
    %c0_i32 = arith.constant 0 : i32
    %c0_i32_0 = arith.constant 0 : i32
    %c0_i32_1 = arith.constant 0 : i32
    return %c0_i32, %c0_i32_0 : i32, i32
  }
  func.func @transform_5(%arg0: i32) -> (i32, i32) {
    %c0_i32 = arith.constant 0 : i32
    %c0_i32_0 = arith.constant 0 : i32
    return %c0_i32, %arg0 : i32, i32
  }
}

</mosaic_0001>

<bundles_post_ra>
// kernel: variance_predictor.1
= control target key start
LH: loop header
LB: loop body
LE: loop exit
PB: predicated region body
PF: predicated region fallthrough
CT: control target
= control target key end

     0   :  { %s1142_s18 = smov 0   ;;  %s1144_s19 = smov 0   ;;  %s1334_s0 = inlined_call_operand.vmem [shape: f32[32,256], index: 0, kind: input, shape index: {}]   ;;  %s1335_s1 = inlined_call_operand.vmem [shape: f32[1,256], index: 1, kind: input, shape index: {}]   ;;  %s1336_s2 = inlined_call_operand.vmem [shape: f32[32,96], index: 2, kind: input, shape index: {}]   ;;  %s1337_s3 = inlined_call_operand.vmem [shape: f32[32,96], index: 3, kind: input, shape index: {}]   ;;  %s1338_s4 = inlined_call_operand.vmem [shape: f32[32,8], index: 4, kind: input, shape index: {}]   ;;  %s1339_s5 = inlined_call_operand.vmem [shape: f32[1,256], index: 5, kind: output, shape index: {}]  }
   0x1   :  { %s1146_s20 = smov 0  }
   0x2 LB: > { %s856_s21 = sadd.s32 4294967295, %s1099_s20   ;;  %s1159_s22 = sadd.s32 1, %s1099_s20   ;;  %s1099_s20 = sphi %s1146_s20, %s1342_s20   ;;  %s1095_s19 = sphi %s1144_s19, %s1341_s19   ;;  %s1091_s18 = sphi %s1142_s18, %s1340_s18  }
   0x3   : > { %s19_s23 = ssub.s32 %s1099_s20, %s1159_s22  ;;  %s22_s24 = sadd.s32 1, %s1095_s19 }
   0x4   : > { %p20_p0 = scmp.eq.s32.totalorder %s19_s23, 0  ;;  %p29_p1 = scmp.ne.s32.totalorder %s1095_s19, %s1091_s18 }
   0x5   : > { %p30_p2 = scmp.eq.s32.totalorder %s1099_s20, 0  ;;  %p859_p4 = scmp.ge.s32.totalorder %s1099_s20, 2 }
   0x6   : > { %s1168_s25 = scalar_select %p20_p0, %s1095_s19, %s22_s24  }
   0x7   : > { %p31_p3 = por %p30_p2, %p29_p1  ;;  %179 = sbr.rel (%p859_p4) target bundleno = 21 (0x15), region = 28 }
   0xe   : > { %182 = sbr.rel (!%p31_p3) target bundleno = 21 (0x15), region = 32  ;;  %s184_s26 = sand.u32 (%p31_p3), 1, %s1095_s19  }
   0xf   : > { %s861_s27 = sshll.u32 (%p31_p3), %s1099_s20, 3  ;;  %s860_s28 = sshll.u32 (%p31_p3), %s184_s26, 5 }
  0x10   : > { %s188_s6 = scalar_lea.vmem (%p31_p3), %s1334_s0, %s861_s27  ;;  %s186_s7 = scalar_lea.vmem (%p31_p3), [#allocation2], %s860_s28 }
  0x11   : > { %v222_v0 = vld [vmem:[%s188_s6] sm:$0xff] (%p31_p3)  ;;  %v224_v1 = vld [vmem:[%s188_s6 + $0x10] sm:$0xff] (%p31_p3) }
  0x12   : > { %v226_v2 = vld [vmem:[%s188_s6 + $0x20] sm:$0xff] (%p31_p3)  ;;  %223 = vst [vmem:[%s186_s7] sm:$0xff] (%p31_p3), %v222_v0  ;;  %225 = vst [vmem:[%s186_s7 + $0x8] sm:$0xff] (%p31_p3), %v224_v1  ;;  %v228_v3 = vld [vmem:[%s188_s6 + $0x30] sm:$0xff] (%p31_p3) }
  0x13   : > { %227 = vst [vmem:[%s186_s7 + $0x10] sm:$0xff] (%p31_p3), %v226_v2  ;;  %229 = vst [vmem:[%s186_s7 + $0x18] sm:$0xff] (%p31_p3), %v228_v3 }
  0x15 PF: > { %p862_p5 = scmp.ge.s32.totalorder %s1099_s20, 1  ;;  %p240_p6 = scmp.lt.s32.totalorder %s1099_s20, 3 }
  0x17   : > { %p241_p7 = pnand %p862_p5, %p240_p6 }
  0x18   : > { %s247_s8 = sand.u32 (!%p241_p7), 1, %s1091_s18   ;;  %s1101_s11 = smov (!%p241_p7), 1   ;;  %v315_v10 = vld [vmem:[%s1336_s2] sm:$0xff] (!%p241_p7)  ;;  %vm363_vm0 = vcmask (!%p241_p7), 785408   ;;  %v1198_v11 = vld [vmem:[%s1338_s4 + $0x8] sm:$0xff] (!%p241_p7)  ;;  %v1103_v13 = vmov (!%p241_p7), 0   ;;  %v285_v18 = vlaneseq (!%p241_p7) }
  0x19   : > { %244 = sbr.rel (%p241_p7) target bundleno = 906 (0x38a), region = 74  ;;  %s863_s9 = sshll.u32 (!%p241_p7), %s247_s8, 5  ;;  %932 = vmatprep.mubr.msk.f32.mxu0 (!%p241_p7), %vm363_vm0, %v315_v10  ;;  %v1203_v12 = vld [vmem:[%s1338_s4] sm:$0xff] (!%p241_p7)  ;;  %1054 = vset.pattern.permute.xlu1 (!%p241_p7), %v1103_v13  ;;  %v1210_v14 = vld [vmem:[%s1338_s4 + $0x10] sm:$0xff] (!%p241_p7)  ;;  %v1215_v15 = vld [vmem:[%s1338_s4 + $0x18] sm:$0xff] (!%p241_p7)  ;;  %v1104_v16 = vmov (!%p241_p7), 1  }
  0x1a   : > { %s249_s10 = scalar_lea.vmem (!%p241_p7), [#allocation2], %s863_s9  ;;  %s1102_s12 = smov (!%p241_p7), 127   ;;  %1053 = vset.pattern.permute.xlu0 (!%p241_p7), %v1103_v13  ;;  %v1105_v17 = vmov (!%p241_p7), 2   ;;  %v286_v19 = vand.u32 (!%p241_p7), 127, %v285_v18  ;;  %v1106_v23 = vmov (!%p241_p7), 0.0   ;;  %v316_v44 = vld [vmem:[%s1336_s2 + $0x8] sm:$0xff] (!%p241_p7) }
  0x1b   : > { %v283_v4 = vld [vmem:[%s249_s10 + $0x10] sm:$0xff] (!%p241_p7)  ;;  %v281_v5 = vld [vmem:[%s249_s10] sm:$0xff] (!%p241_p7)  ;;  %v282_v6 = vld [vmem:[%s249_s10 + $0x8] sm:$0xff] (!%p241_p7)  ;;  %p275_p8 = scmp.lt.s32.totalorder (!%p241_p7), %s856_s21, 1 }
  0x1c   : > { %323 = vrot.lane.b32.xlu1 (!%p241_p7), %v283_v4, %s1101_s11  ;;  %319 = vrot.lane.b32.xlu0 (!%p241_p7), %v281_v5, %s1101_s11  ;;  %v284_v7 = vld [vmem:[%s249_s10 + $0x18] sm:$0xff] (!%p241_p7)  ;;  %v1181_v8 = vpack.c.bf16 (!%p241_p7), %v282_v6, %v281_v5  ;;  %v291_v20 = vand.u32 (!%p241_p7), 15, %v286_v19  ;;  %v317_v45 = vld [vmem:[%s1336_s2 + $0x10] sm:$0xff] (!%p241_p7) }
  0x1d   : > { %v1185_v9 = vpack.c.bf16 (!%p241_p7), %v284_v7, %v283_v4  ;;  %v318_v46 = vld [vmem:[%s1336_s2 + $0x18] sm:$0xff] (!%p241_p7) }
  0x1e   : > { %vm299_vm1 = vcmp.ne.s32.totalorder (!%p241_p7), %v291_v20, 0  ;;  %vm302_vm2 = vcmp.ne.s32.totalorder (!%p241_p7), %v291_v20, 15 }
  0x1f   : > { %v1227_v24 = vsel (!%p241_p7), %vm299_vm1, 1.0, %v1106_v23  ;;  %v1233_v35 = vsel (!%p241_p7), %vm302_vm2, 1.0, %v1106_v23 }
  0x20   : > { %325 = vrot.lane.b32.xlu1 %v284_v7, %s1101_s11  ;;  %321 = vrot.lane.b32.xlu0 %v282_v6, %s1101_s11  ;;  %s1344_s21 = smov (!%p275_p8, %s856_s21), 1 }
  0x21   : > { %s277_s27 = scalar_lea.vmem %s1335_s1, %s1344_s21  ;;  %s280_s6 = scalar_lea.vmem %s1339_s5, %s1344_s21 }
  0x24   : > { %333 = vrot.lane.b32.xlu1 %v282_v6, %s1102_s12  ;;  %331 = vrot.lane.b32.xlu0 %v281_v5, %s1102_s12 }
  0x28   : > { %337 = vrot.lane.b32.xlu1 %v284_v7, %s1102_s12  ;;  %335 = vrot.lane.b32.xlu0 %v283_v4, %s1102_s12 }
  0x2c   : > { %350 = vperm.xlu1 %1054, %v1198_v11   ;;  %345 = vperm.xlu0 %1053, %v1203_v12  }
  0x30   : > { %355 = vperm.xlu1 %1054, %v1210_v14   ;;  %360 = vperm.xlu0 %1053, %v1215_v15  }
  0x34   : > { %1055 = vset.pattern.permute.xlu1 %v1104_v16  ;;  %1056 = vset.pattern.permute.xlu0 %v1104_v16 }
  0x35   : > { %501 = vperm.xlu1 %1055, %v1203_v12   ;;  %505 = vperm.xlu0 %1056, %v1198_v11  }
  0x39   : > { %1057 = vset.pattern.permute.xlu1 %v1105_v17  ;;  %509 = vperm.xlu0 %1056, %v1210_v14  }
  0x3a   : > { %521 = vperm.xlu1 %1057, %v1203_v12  }
  0x3d   : > { %1059 = vset.pattern.permute.xlu0 %v1105_v17 }
  0x3e   : > { %525 = vperm.xlu1 %1057, %v1198_v11   ;;  %529 = vperm.xlu0 %1059, %v1210_v14  }
  0x42   : > { %1058 = vset.pattern.permute.xlu1 %v1104_v16 }
  0x43   : > { %513 = vperm.xlu1 %1058, %v1215_v15  }
  0x47   : > { %1060 = vset.pattern.permute.xlu1 %v1105_v17 }
  0x48   : > { %533 = vperm.xlu1 %1060, %v1215_v15  }
  0x8e   : > { %v324_v21 = vpop.permute.xlu1 %323  ;;  %v320_v22 = vpop.permute.xlu0 %319 }
  0x8f   : > { %v329_v27 = vmul.f32 %v1227_v24, %v324_v21  ;;  %v327_v28 = vmul.f32 %v1227_v24, %v320_v22 }
  0x92   : > { %v326_v25 = vpop.permute.xlu1 %325  ;;  %v322_v26 = vpop.permute.xlu0 %321 }
  0x93   : > { %v330_v29 = vmul.f32 %v1227_v24, %v326_v25  ;;  %v328_v30 = vmul.f32 %v1227_v24, %v322_v26 }
  0x95   : > { %v968_v31 = vpack.c.bf16 %v328_v30, %v327_v28  ;;  %v972_v32 = vpack.c.bf16 %v330_v29, %v329_v27 }
  0x96   : > { %v334_v33 = vpop.permute.xlu1 %333  ;;  %v332_v34 = vpop.permute.xlu0 %331 }
  0x97   : > { %969 = vmatprep.subr.bf16.mxu0 %v968_v31  ;;  %v340_v36 = vmul.f32 %v1233_v35, %v334_v33  ;;  %v339_v37 = vmul.f32 %v1233_v35, %v332_v34 }
  0x98   : > { %971 = vmatpush3.bf16.msra.mxu0 %v968_v31 }
  0x99   : > { %973 = vmatprep.subr.bf16.mxu0 %v972_v32  ;;  %v984_v40 = vpack.c.bf16 %v340_v36, %v339_v37 }
  0x9a   : > { %v338_v38 = vpop.permute.xlu1 %337  ;;  %v336_v39 = vpop.permute.xlu0 %335 }
  0x9b   : > { %v342_v41 = vmul.f32 %v1233_v35, %v338_v38  ;;  %v341_v42 = vmul.f32 %v1233_v35, %v336_v39 }
  0x9c   : > { %975 = vmatpush3.bf16.msra.mxu0 %v972_v32 }
  0x9d   : > { %977 = vmatprep.subr.bf16.mxu0 %v1181_v8  ;;  %v988_v43 = vpack.c.bf16 %v342_v41, %v341_v42 }
  0xa0   : > { %979 = vmatpush3.bf16.msra.mxu0 %v1181_v8 }
  0xa1   : > { %981 = vmatprep.subr.bf16.mxu0 %v1185_v9 }
  0xa4   : > { %983 = vmatpush3.bf16.msra.mxu0 %v1185_v9 }
  0xa5   : > { %985 = vmatprep.subr.bf16.mxu0 %v984_v40 }
  0xa8   : > { %987 = vmatpush3.bf16.msra.mxu0 %v984_v40 }
  0xa9   : > { %989 = vmatprep.subr.bf16.mxu0 %v988_v43 }
  0xab   : > { %v346_v47 = vpop.permute.xlu0 %345  ;;  %v351_v48 = vpop.permute.xlu1 %350 }
  0xac   : > { %991 = vmatpush3.bf16.msra.mxu0 %v988_v43 }
  0xaf   : > { %933 = vmatmul.mubr.msk.f32.vlgmr.msra.gmra.mrb[0].mxu0 %vm363_vm0, %v316_v44  ;;  %v361_v54 = vpop.permute.xlu0 %360  ;;  %v356_v57 = vpop.permute.xlu1 %355 }
  0xb0   : > { %935 = vmatprep.mubr.msk.f32.mxu0 %vm363_vm0, %v317_v45 }
  0xb3   : > { %936 = vmatmul.mubr.msk.f32.gmra.mrb[2].mxu0 %vm363_vm0, %v318_v46 }
  0xb4   : > { %v502_v28 = vpop.permute.xlu1 %501  ;;  %v506_v36 = vpop.permute.xlu0 %505 }
  0xb8   : > { %v510_v38 = vpop.permute.xlu0 %509 }
  0xb9   : > { %v522_v33 = vpop.permute.xlu1 %521 }
  0xbd   : > { %v526_v37 = vpop.permute.xlu1 %525  ;;  %v530_v46 = vpop.permute.xlu0 %529 }
  0xc2   : > { %v514_v39 = vpop.permute.xlu1 %513 }
  0xc7   : > { %v534_v45 = vpop.permute.xlu1 %533 }
 0x182   : > { %v934_v49 = vpop.f32.mrb[0].mxu0 }
 0x183   : > { %v448_v50 = vadd.f32 %v934_v49, %v351_v48  ;;  %v442_v51 = vpop.f32.mrb[1].mxu0 }
 0x184   : > { %v443_v52 = vadd.f32 %v442_v51, %v346_v47 }
 0x185   : > { %v462_v53 = vmax.f32 %v448_v50, 0.0 }
 0x186   : > { %v461_v55 = vmax.f32 %v443_v52, 0.0  ;;  %v937_v56 = vpop.f32.mrb[2].mxu0 }
 0x187   : > { %v452_v58 = vpop.f32.mrb[3].mxu0  ;;  %v458_v60 = vadd.f32 %v937_v56, %v361_v54 }
 0x188   : > { %v465_v59 = vadd.f32 %v462_v53, %v461_v55  ;;  %v453_v61 = vadd.f32 %v452_v58, %v356_v57  ;;  %v540_v57 = vld [vmem:[%s1337_s3] sm:$0xff]  ;;  %v1107_v58 = vmov 3  }
 0x189   : > { %v464_v63 = vmax.f32 %v458_v60, 0.0  ;;  %962 = vmatprep.mubr.msk.f32.mxu1 %vm363_vm0, %v540_v57  ;;  %1061 = vset.pattern.permute.xlu1 %v1107_v58  ;;  %v1109_v60 = vmov 4  }
 0x18a   : > { %v463_v62 = vmax.f32 %v453_v61, 0.0  ;;  %1062 = vset.pattern.permute.xlu0 %v1107_v58  ;;  %v1110_v61 = vmov 5  }
 0x18c   : > { %v466_v0 = vadd.f32 %v465_v59, %v463_v62  ;;  %v309_v59 = vld [vmem:[%s1338_s4] sm:$0x1] }
 0x18e   : > { %v467_v1 = vadd.f32 %v466_v0, %v464_v63 }
 0x190   : > { %v468_v2 = vrot.slane %v467_v1, 4 }
 0x192   : > { %v469_v3 = vadd.f32 %v468_v2, %v467_v1 }
 0x194   : > { %v470_v4 = vrot.slane %v469_v3, 2 }
 0x196   : > { %v471_v5 = vadd.f32 %v470_v4, %v469_v3 }
 0x198   : > { %v472_v6 = vrot.slane %v471_v5, 1 }
 0x19a   : > { %v473_v7 = vadd.f32 %v472_v6, %v471_v5 }
 0x19c   : > { %v475_v8 = vmul.f32 0.03125, %v473_v7 }
 0x19e   : > { %v478_v9 = vsub.f32 %v463_v62, %v475_v8  ;;  %v479_v10 = vsub.f32 %v464_v63, %v475_v8  ;;  %v476_v13 = vsub.f32 %v461_v55, %v475_v8  ;;  %v477_v16 = vsub.f32 %v462_v53, %v475_v8 }
 0x19f   : > { %v1111_v62 = vmov 6  }
 0x1a0   : > { %v480_v17 = vmul.f32 %v476_v13, %v476_v13  ;;  %v481_v18 = vmul.f32 %v477_v16, %v477_v16  ;;  %v482_v19 = vmul.f32 %v478_v9, %v478_v9  ;;  %v483_v21 = vmul.f32 %v479_v10, %v479_v10 }
 0x1a2   : > { %v484_v20 = vadd.f32 %v481_v18, %v480_v17  ;;  %v541_v18 = vld [vmem:[%s1337_s3 + $0x8] sm:$0xff] }
 0x1a4   : > { %v485_v22 = vadd.f32 %v484_v20, %v482_v19  ;;  %v542_v19 = vld [vmem:[%s1337_s3 + $0x10] sm:$0xff] }
 0x1a6   : > { %v486_v23 = vadd.f32 %v485_v22, %v483_v21 }
 0x1a8   : > { %v487_v25 = vrot.slane %v486_v23, 4 }
 0x1aa   : > { %v488_v26 = vadd.f32 %v487_v25, %v486_v23 }
 0x1ac   : > { %v489_v27 = vrot.slane %v488_v26, 2 }
 0x1ae   : > { %v490_v29 = vadd.f32 %v489_v27, %v488_v26 }
 0x1b0   : > { %v491_v30 = vrot.slane %v490_v29, 1 }
 0x1b2   : > { %v492_v31 = vadd.f32 %v491_v30, %v490_v29 }
 0x1b4   : > { %v493_v32 = vmul.f32 0.03125, %v492_v31 }
 0x1b6   : > { %v494_v34 = vadd.f32 1e-05, %v493_v32 }
 0x1b8   : > { %1073 = vrsqrt.f32 %v494_v34 }
 0x1c2   : > { %v1074_v40 = vpop.eup %1073 }
 0x1c3   : > { %v496_v41 = vmul.f32 %v1074_v40, %v476_v13  ;;  %v497_v42 = vmul.f32 %v1074_v40, %v477_v16  ;;  %v498_v43 = vmul.f32 %v1074_v40, %v478_v9  ;;  %v499_v44 = vmul.f32 %v1074_v40, %v479_v10 }
 0x1c5   : > { %v516_v47 = vmul.f32 %v502_v28, %v496_v41  ;;  %v517_v48 = vmul.f32 %v506_v36, %v497_v42  ;;  %v518_v49 = vmul.f32 %v510_v38, %v498_v43  ;;  %v519_v50 = vmul.f32 %v514_v39, %v499_v44 }
 0x1c7   : > { %v536_v51 = vadd.f32 %v522_v33, %v516_v47  ;;  %v537_v52 = vadd.f32 %v526_v37, %v517_v48  ;;  %v539_v53 = vadd.f32 %v534_v45, %v519_v50  ;;  %v538_v54 = vadd.f32 %v530_v46, %v518_v49 }
 0x1c9   : > { %546 = vrot.lane.b32.xlu0 %v537_v52, %s1101_s11  ;;  %544 = vrot.lane.b32.xlu1 %v536_v51, %s1101_s11  ;;  %v1257_v55 = vpack.c.bf16 %v537_v52, %v536_v51  ;;  %v1259_v56 = vpack.c.bf16 %v539_v53, %v538_v54 }
 0x1cd   : > { %550 = vrot.lane.b32.xlu0 %v539_v53, %s1101_s11  ;;  %548 = vrot.lane.b32.xlu1 %v538_v54, %s1101_s11 }
 0x1d1   : > { %558 = vrot.lane.b32.xlu0 %v537_v52, %s1102_s12  ;;  %556 = vrot.lane.b32.xlu1 %v536_v51, %s1102_s12 }
 0x1d5   : > { %562 = vrot.lane.b32.xlu0 %v539_v53, %s1102_s12  ;;  %560 = vrot.lane.b32.xlu1 %v538_v54, %s1102_s12  ;;  %s1108_s12 = smov 121  }
 0x1d9   : > { %569 = vperm.xlu1 %1061, %v1203_v12   ;;  %573 = vperm.xlu0 %1062, %v1198_v11  }
 0x1dd   : > { %577 = vperm.xlu1 %1061, %v1210_v14   ;;  %311 = vrot.lane.b32.xlu0 %v309_v59, %s1108_s12 }
 0x1de   : > { %1064 = vset.pattern.permute.xlu0 %v1109_v60 }
 0x1e1   : > { %581 = vperm.xlu1 %1061, %v1215_v15   ;;  %724 = vperm.xlu0 %1064, %v1198_v11  }
 0x1e5   : > { %1063 = vset.pattern.permute.xlu1 %v1109_v60  ;;  %1066 = vset.pattern.permute.xlu0 %v1110_v61 }
 0x1e6   : > { %720 = vperm.xlu1 %1063, %v1203_v12   ;;  %744 = vperm.xlu0 %1066, %v1198_v11  }
 0x1ea   : > { %728 = vperm.xlu1 %1063, %v1210_v14   ;;  %1069 = vset.pattern.permute.xlu0 %v1111_v62 }
 0x1eb   : > { %760 = vperm.xlu0 %1069, %v1203_v12  }
 0x1ee   : > { %1065 = vset.pattern.permute.xlu1 %v1110_v61 }
 0x1ef   : > { %740 = vperm.xlu1 %1065, %v1203_v12   ;;  %768 = vperm.xlu0 %1069, %v1210_v14  }
 0x1f3   : > { %1067 = vset.pattern.permute.xlu1 %v1109_v60 }
 0x1f4   : > { %732 = vperm.xlu1 %1067, %v1215_v15  }
 0x1f8   : > { %1068 = vset.pattern.permute.xlu1 %v1110_v61 }
 0x1f9   : > { %748 = vperm.xlu1 %1068, %v1210_v14  }
 0x1fd   : > { %1070 = vset.pattern.permute.xlu1 %v1111_v62 }
 0x1fe   : > { %764 = vperm.xlu1 %1070, %v1198_v11  }
 0x202   : > { %1071 = vset.pattern.permute.xlu1 %v1110_v61 }
 0x203   : > { %752 = vperm.xlu1 %1071, %v1215_v15  }
 0x207   : > { %1072 = vset.pattern.permute.xlu1 %v1111_v62 }
 0x208   : > { %772 = vperm.xlu1 %1072, %v1215_v15  }
 0x23b   : > { %v547_v63 = vpop.permute.xlu0 %546  ;;  %v545_v0 = vpop.permute.xlu1 %544 }
 0x23c   : > { %v553_v12 = vmul.f32 %v1227_v24, %v547_v63  ;;  %v552_v1 = vmul.f32 %v1227_v24, %v545_v0 }
 0x23e   : > { %v992_v2 = vpack.c.bf16 %v553_v12, %v552_v1 }
 0x23f   : > { %v551_v3 = vpop.permute.xlu0 %550  ;;  %v549_v4 = vpop.permute.xlu1 %548 }
 0x240   : > { %v555_v14 = vmul.f32 %v1227_v24, %v551_v3  ;;  %v554_v5 = vmul.f32 %v1227_v24, %v549_v4  ;;  %993 = vmatprep.subr.bf16.mxu1 %v992_v2 }
 0x241   : > { %995 = vmatpush3.bf16.msra.mxu1 %v992_v2 }
 0x242   : > { %v996_v11 = vpack.c.bf16 %v555_v14, %v554_v5 }
 0x243   : > { %v559_v6 = vpop.permute.xlu0 %558  ;;  %v557_v7 = vpop.permute.xlu1 %556 }
 0x244   : > { %997 = vmatprep.subr.bf16.mxu1 %v996_v11  ;;  %v565_v15 = vmul.f32 %v1233_v35, %v559_v6  ;;  %v564_v8 = vmul.f32 %v1233_v35, %v557_v7 }
 0x245   : > { %999 = vmatpush3.bf16.msra.mxu1 %v996_v11 }
 0x246   : > { %1001 = vmatprep.subr.bf16.mxu1 %v1257_v55  ;;  %v1008_v24 = vpack.c.bf16 %v565_v15, %v564_v8 }
 0x247   : > { %v563_v9 = vpop.permute.xlu0 %562  ;;  %v561_v10 = vpop.permute.xlu1 %560 }
 0x248   : > { %v567_v13 = vmul.f32 %v1233_v35, %v563_v9  ;;  %v566_v16 = vmul.f32 %v1233_v35, %v561_v10  ;;  %v543_v35 = vld [vmem:[%s1337_s3 + $0x18] sm:$0xff] }
 0x249   : > { %1003 = vmatpush3.bf16.msra.mxu1 %v1257_v55 }
 0x24a   : > { %1005 = vmatprep.subr.bf16.mxu1 %v1259_v56  ;;  %v1012_v17 = vpack.c.bf16 %v567_v13, %v566_v16 }
 0x24d   : > { %1007 = vmatpush3.bf16.msra.mxu1 %v1259_v56 }
 0x24e   : > { %1009 = vmatprep.subr.bf16.mxu1 %v1008_v24 }
 0x251   : > { %1011 = vmatpush3.bf16.msra.mxu1 %v1008_v24 }
 0x252   : > { %1013 = vmatprep.subr.bf16.mxu1 %v1012_v17 }
 0x255   : > { %1015 = vmatpush3.bf16.msra.mxu1 %v1012_v17 }
 0x258   : > { %963 = vmatmul.mubr.msk.f32.vlgmr.msra.gmra.mrb[0].mxu1 %vm363_vm0, %v541_v18  ;;  %v574_v20 = vpop.permute.xlu0 %573  ;;  %v570_v22 = vpop.permute.xlu1 %569 }
 0x259   : > { %965 = vmatprep.mubr.msk.f32.mxu1 %vm363_vm0, %v542_v19 }
 0x25c   : > { %966 = vmatmul.mubr.msk.f32.gmra.mrb[2].mxu1 %vm363_vm0, %v543_v35  ;;  %v312_v21 = vpop.permute.xlu0 %311  ;;  %v578_v23 = vpop.permute.xlu1 %577 }
 0x25d   : > { %1016 = vpush %v312_v21 }
 0x260   : > { %v582_v32 = vpop.permute.xlu1 %581  ;;  %v725_v11 = vpop.permute.xlu0 %724 }
 0x265   : > { %v721_v56 = vpop.permute.xlu1 %720  ;;  %v745_v7 = vpop.permute.xlu0 %744 }
 0x269   : > { %v729_v62 = vpop.permute.xlu1 %728 }
 0x26a   : > { %v761_v16 = vpop.permute.xlu0 %760 }
 0x26e   : > { %v741_v12 = vpop.permute.xlu1 %740 }
 0x273   : > { %v733_v4 = vpop.permute.xlu1 %732 }
 0x278   : > { %v749_v6 = vpop.permute.xlu1 %748 }
 0x27d   : > { %v765_v15 = vpop.permute.xlu1 %764 }
 0x282   : > { %v753_v17 = vpop.permute.xlu1 %752 }
 0x28e   : > { %s1017_s28 = spop %1016 }
 0x32b   : > { %v964_v25 = vpop.f32.mrb[0].mxu1 }
 0x32c   : > { %v668_v26 = vadd.f32 %v964_v25, %v574_v20  ;;  %v662_v27 = vpop.f32.mrb[1].mxu1 }
 0x32d   : > { %v663_v28 = vadd.f32 %v662_v27, %v570_v22 }
 0x32e   : > { %v682_v29 = vmax.f32 %v668_v26, 0.0 }
 0x32f   : > { %v681_v30 = vmax.f32 %v663_v28, 0.0  ;;  %v967_v31 = vpop.f32.mrb[2].mxu1  ;;  %v769_v28 = vpop.permute.xlu0 %768 }
 0x330   : > { %v672_v33 = vpop.f32.mrb[3].mxu1  ;;  %v678_v36 = vadd.f32 %v967_v31, %v582_v32 }
 0x331   : > { %v685_v34 = vadd.f32 %v682_v29, %v681_v30  ;;  %v673_v37 = vadd.f32 %v672_v33, %v578_v23 }
 0x332   : > { %v684_v39 = vmax.f32 %v678_v36, 0.0 }
 0x333   : > { %v683_v38 = vmax.f32 %v673_v37, 0.0 }
 0x335   : > { %v686_v40 = vadd.f32 %v685_v34, %v683_v38 }
 0x337   : > { %v687_v41 = vadd.f32 %v686_v40, %v684_v39 }
 0x339   : > { %v688_v42 = vrot.slane %v687_v41, 4 }
 0x33b   : > { %v689_v43 = vadd.f32 %v688_v42, %v687_v41  ;;  %v790_v41 = vld [vmem:[%s277_s27] sm:$0x1]  ;;  %v788_v42 = vstv %s1017_s28 }
 0x33c   : > { %vm791_vm3 = vcmp.ne.f32.partialorder %v790_v41, 0.0 }
 0x33d   : > { %v690_v44 = vrot.slane %v689_v43, 2 }
 0x33f   : > { %v691_v45 = vadd.f32 %v690_v44, %v689_v43 }
 0x341   : > { %v692_v46 = vrot.slane %v691_v45, 1 }
 0x343   : > { %v693_v47 = vadd.f32 %v692_v46, %v691_v45 }
 0x345   : > { %v694_v48 = vmul.f32 0.03125, %v693_v47 }
 0x347   : > { %v697_v49 = vsub.f32 %v683_v38, %v694_v48  ;;  %v698_v50 = vsub.f32 %v684_v39, %v694_v48  ;;  %v695_v51 = vsub.f32 %v681_v30, %v694_v48  ;;  %v696_v52 = vsub.f32 %v682_v29, %v694_v48  ;;  %v773_v29 = vpop.permute.xlu1 %772 }
 0x349   : > { %v699_v53 = vmul.f32 %v695_v51, %v695_v51  ;;  %v700_v54 = vmul.f32 %v696_v52, %v696_v52  ;;  %v701_v55 = vmul.f32 %v697_v49, %v697_v49  ;;  %v702_v58 = vmul.f32 %v698_v50, %v698_v50 }
 0x34b   : > { %v703_v57 = vadd.f32 %v700_v54, %v699_v53 }
 0x34d   : > { %v704_v59 = vadd.f32 %v703_v57, %v701_v55 }
 0x34f   : > { %v705_v60 = vadd.f32 %v704_v59, %v702_v58 }
 0x351   : > { %v706_v61 = vrot.slane %v705_v60, 4 }
 0x353   : > { %v707_v63 = vadd.f32 %v706_v61, %v705_v60 }
 0x355   : > { %v708_v0 = vrot.slane %v707_v63, 2 }
 0x357   : > { %v709_v1 = vadd.f32 %v708_v0, %v707_v63 }
 0x359   : > { %v710_v2 = vrot.slane %v709_v1, 1 }
 0x35b   : > { %v711_v3 = vadd.f32 %v710_v2, %v709_v1 }
 0x35d   : > { %v712_v14 = vmul.f32 0.03125, %v711_v3 }
 0x35f   : > { %v713_v5 = vadd.f32 1e-05, %v712_v14 }
 0x361   : > { %1075 = vrsqrt.f32 %v713_v5 }
 0x36b   : > { %v1076_v8 = vpop.eup %1075 }
 0x36c   : > { %v715_v9 = vmul.f32 %v1076_v8, %v695_v51  ;;  %v717_v10 = vmul.f32 %v1076_v8, %v697_v49  ;;  %v718_v24 = vmul.f32 %v1076_v8, %v698_v50  ;;  %v716_v13 = vmul.f32 %v1076_v8, %v696_v52 }
 0x36e   : > { %v735_v18 = vmul.f32 %v721_v56, %v715_v9  ;;  %v737_v19 = vmul.f32 %v729_v62, %v717_v10  ;;  %v738_v35 = vmul.f32 %v733_v4, %v718_v24  ;;  %v736_v20 = vmul.f32 %v725_v11, %v716_v13 }
 0x370   : > { %v755_v21 = vadd.f32 %v741_v12, %v735_v18  ;;  %v757_v22 = vadd.f32 %v749_v6, %v737_v19  ;;  %v756_v23 = vadd.f32 %v745_v7, %v736_v20  ;;  %v758_v27 = vadd.f32 %v753_v17, %v738_v35 }
 0x372   : > { %v776_v25 = vmul.f32 %v765_v15, %v756_v23  ;;  %v775_v26 = vmul.f32 %v761_v16, %v755_v21  ;;  %v777_v31 = vmul.f32 %v769_v28, %v757_v22  ;;  %v778_v33 = vmul.f32 %v773_v29, %v758_v27 }
 0x374   : > { %v779_v30 = vadd.f32 %v776_v25, %v775_v26 }
 0x376   : > { %v780_v32 = vadd.f32 %v779_v30, %v777_v31 }
 0x378   : > { %v781_v34 = vadd.f32 %v780_v32, %v778_v33 }
 0x37a   : > { %v782_v36 = vrot.slane %v781_v34, 4 }
 0x37c   : > { %v783_v37 = vadd.f32 %v782_v36, %v781_v34 }
 0x37e   : > { %v784_v38 = vrot.slane %v783_v37, 2 }
 0x380   : > { %v785_v39 = vadd.f32 %v784_v38, %v783_v37 }
 0x382   : > { %v786_v40 = vrot.slane %v785_v39, 1 }
 0x384   : > { %v787_v43 = vadd.f32 %v786_v40, %v785_v39 }
 0x386   : > { %v789_v44 = vadd.f32 %v788_v42, %v787_v43 }
 0x388   : > { %v792_v45 = vsel %vm791_vm3, 0.0, %v789_v44 }
 0x389   : > { %793 = vst [vmem:[%s280_s6] sm:$0x1] %v792_v45 }
 0x38a PF: > { %p12_p9 = scmp.ge.s32.totalorder %s1159_s22, 4   ;;  %s1340_s18 = smov %s1095_s19 }
 0x38b   : > { %s1341_s19 = smov %s1168_s25  ;;  %s1342_s20 = smov %s1159_s22 }
 0x38c   :  { %14 = sbr.rel (!%p12_p9) target bundleno = 2 (0x2), region = 116 }

</bundles_post_ra>
